<compile_context>
chip_gen: v7x
topology: tpu7x:2x2x1
jax: 0.10.0
libtpu: 0.0.40
codegen_flags: <defaults>
</compile_context>

<pallas_src>
import jax
import jax.numpy as jnp
from jax.experimental import pallas as pl
from jax.experimental.pallas import tpu as pltpu


def _round_up(x, m):
    return ((x + m - 1) // m) * m


def _tanh_in_bf16():
    """bf16 EUP tanh path exists on v6e/v7x; keep f32 tanh on v2-v5."""
    try:
        kind = jax.devices()[0].device_kind.lower()
    except Exception:
        return False
    return not any(v in kind for v in ("v2", "v3", "v4", "v5"))


def _make_mlp_kernel(n_linear, ac_dim, tanh_bf16, out_dtype):
    """Kernel for one batch tile: obs -> mean through n_linear Linear layers."""

    def kernel(*refs):
        # refs = [obs, w0, ..., w_{L-1}, bias_pack, mean_out]
        obs_ref = refs[0]
        w_refs = refs[1:1 + n_linear]
        bias_ref = refs[1 + n_linear]
        mean_ref = refs[2 + n_linear]

        h = obs_ref[...].astype(jnp.bfloat16)           # [tb, ob_dim] (cast in VMEM)
        for l in range(n_linear):
            w = w_refs[l][...]                          # bf16 [in_eff, out_pad]
            out_pad = w.shape[1]
            b = bias_ref[l:l + 1, 0:out_pad]            # f32  [1, out_pad] (static slice)
            # MXU: bf16 x bf16 inputs, f32 accumulation.
            h32 = jnp.dot(h, w, preferred_element_type=jnp.float32) + b
            if l < n_linear - 1:
                if tanh_bf16:
                    h = jnp.tanh(h32.astype(jnp.bfloat16))   # v6e/v7x bf16 EUP path
                else:
                    h = jnp.tanh(h32).astype(jnp.bfloat16)   # v5e: f32 tanh
            else:
                # Store only the real ac_dim lanes, in bf16 (small, unpadded stream).
                mean_ref[...] = h32[:, :ac_dim].astype(out_dtype)

    return kernel


def mlp_policy_forward(obs, weights, biases, logstd, *, block_batch=512):
    """Pallas forward pass. Returns (mean [B, ac_dim] f32, std [ac_dim] f32)."""
    assert len(weights) == len(biases)
    n_linear = len(weights)
    batch, ob_dim = obs.shape
    ac_dim = int(logstd.shape[0])

    in_dims = [int(w.shape[0]) for w in weights]
    out_dims = [int(w.shape[1]) for w in weights]
    assert in_dims[0] == ob_dim and out_dims[-1] == ac_dim

    # Hidden / intermediate widths padded to 128 lanes (lane-dense weights, full MXU
    # columns); the obs input dim and the stored output stay at their natural
    # full-extent widths (legal BlockSpec: block == full array dim).
    out_pads = [_round_up(d, 128) for d in out_dims]
    in_effs = [ob_dim] + out_pads[:-1]
    max_out_pad = max(out_pads)

    # ---- batch tiling ----
    block_batch = max(256, _round_up(int(block_batch), 256))
    if batch >= 512:
        # At least two grid steps so v7x's two TensorCores both get work.
        tb = min(block_batch, _round_up(pl.cdiv(batch, 2), 16))
    else:
        tb = min(block_batch, _round_up(batch, 16))      # 16 = bf16 sublane tile
    batch_pad = _round_up(batch, tb)
    grid = (batch_pad // tb,)

    # obs streams in f32 and is cast to bf16 inside the kernel (single HBM pass,
    # no wrapper lane-pad round trip). Only a small row pad when needed.
    obs_p = obs.astype(jnp.float32)
    if batch_pad != batch:
        obs_p = jnp.pad(obs_p, ((0, batch_pad - batch), (0, 0)))

    # Params: bf16 weights zero-padded on the 128-lane sides (exact: tanh(0)=0),
    # biases packed into one resident f32 table (single DMA). In a jitted training
    # step these preps are constant-folded / done once.
    w_padded = []
    for l, w in enumerate(weights):
        wb = w.astype(jnp.bfloat16)
        pad_r = in_effs[l] - in_dims[l]
        pad_c = out_pads[l] - out_dims[l]
        if pad_r or pad_c:
            wb = jnp.pad(wb, ((0, pad_r), (0, pad_c)))
        w_padded.append(wb)

    bias_pack = jnp.zeros((n_linear, max_out_pad), jnp.float32)
    for l, b in enumerate(biases):
        bias_pack = bias_pack.at[l, :out_dims[l]].set(b.astype(jnp.float32))

    # ---- scheduler hint + generation-aware VMEM budget ----
    flops = 2 * batch_pad * sum(ie * op for ie, op in zip(in_effs, out_pads))
    transcendentals = batch_pad * sum(out_pads[:-1])
    w_bytes = sum(ie * op * 2 for ie, op in zip(in_effs, out_pads))
    bias_bytes = n_linear * max_out_pad * 4
    bytes_accessed = (batch_pad * ob_dim * 4 + w_bytes + bias_bytes
                      + batch_pad * ac_dim * 2)
    resident = (2 * w_bytes + 2 * bias_bytes                  # params (worst case: 2 bufs)
                + 2 * tb * ob_dim * 4 + 2 * tb * ac_dim * 2   # streamed blocks, 2 bufs
                + 2 * tb * max_out_pad * 4)                   # live f32 activations
    try:
        cap = int(pltpu.get_tpu_info().vmem_capacity_bytes) * 3 // 4   # ~96 MiB v5e/v6e, ~48 MiB v7x
    except Exception:
        cap = 48 << 20                                        # v7x-safe default
    vmem_limit = int(max(min(resident + (8 << 20), cap), resident + (2 << 20)))

    kernel = _make_mlp_kernel(n_linear, ac_dim, _tanh_in_bf16(), jnp.bfloat16)

    def _param_spec(shape, pm):
        if pm is None:
            return pl.BlockSpec(shape, lambda i: (0, 0))
        return pl.BlockSpec(shape, lambda i: (0, 0), pipeline_mode=pm)

    def _run(single_buffer_params):
        pm = pl.Buffered(1) if single_buffer_params else None
        obs_spec = pl.BlockSpec((tb, ob_dim), lambda i: (i, 0))
        w_specs = [_param_spec(tuple(wp.shape), pm) for wp in w_padded]
        bias_spec = _param_spec((n_linear, max_out_pad), pm)
        mean_spec = pl.BlockSpec((tb, ac_dim), lambda i: (i, 0))
        return pl.pallas_call(
            kernel,
            out_shape=jax.ShapeDtypeStruct((batch_pad, ac_dim), jnp.bfloat16),
            grid_spec=pltpu.PrefetchScalarGridSpec(
                num_scalar_prefetch=0,
                grid=grid,
                in_specs=[obs_spec] + w_specs + [bias_spec],
                out_specs=mean_spec,
            ),
            compiler_params=pltpu.CompilerParams(
                dimension_semantics=("parallel",),
                vmem_limit_bytes=vmem_limit,
            ),
            cost_estimate=pl.CostEstimate(
                flops=flops,
                transcendentals=transcendentals,
                bytes_accessed=bytes_accessed,
            ),
        )(obs_p, *w_padded, bias_pack)

    try:
        # Resident params (constant index_map) only need one buffer; halves their
        # VMEM footprint (matters most on v7x's 64 MiB VMEM / large hidden widths).
        mean_padded = _run(True)
    except Exception:
        mean_padded = _run(False)   # fall back to default double buffering

    mean = mean_padded[:batch].astype(jnp.float32)   # module contract: f32 mean
    std = jnp.exp(logstd)                            # batch-independent; out of kernel
    return mean, std


def init_mlp_policy_params(key, ob_dim, ac_dim, n_layers, size):
    """Deterministic init matching the layer shapes of ptu.build_mlp.

    Weights stored as [in, out] (transpose of PyTorch's [out, in]) so the kernel
    computes h @ W + b. logstd initialized to zeros (as in MLPPolicy.__init__).
    """
    dims = [ob_dim] + [size] * n_layers + [ac_dim]
    weights, biases = [], []
    for l in range(len(dims) - 1):
        fan_in, fan_out = dims[l], dims[l + 1]
        key, kw, kb = jax.random.split(key, 3)
        bound = 1.0 / jnp.sqrt(jnp.float32(fan_in))
        w = jax.random.uniform(kw, (fan_in, fan_out), jnp.float32, -bound, bound)
        b = jax.random.uniform(kb, (fan_out,), jnp.float32, -bound, bound)
        weights.append(w)
        biases.append(b)
    logstd = jnp.zeros((ac_dim,), jnp.float32)
    return weights, biases, logstd


def reference_forward(obs, weights, biases, logstd):
    """Pure-JAX f32 reference for correctness checking."""
    h = obs
    n_linear = len(weights)
    for l in range(n_linear):
        h = h @ weights[l] + biases[l]
        if l < n_linear - 1:
            h = jnp.tanh(h)
    return h, jnp.exp(logstd)


if __name__ == "__main__":
    # Small shapes consistent with the module: continuous-action MLP policy.
    batch = 8
    ob_dim = 16
    ac_dim = 4
    n_layers = 2
    size = 32

    key = jax.random.PRNGKey(0)
    key, kobs = jax.random.split(key)
    obs = jax.random.normal(kobs, (batch, ob_dim), jnp.float32)

    weights, biases, logstd = init_mlp_policy_params(
        key, ob_dim, ac_dim, n_layers, size)

    mean, std = mlp_policy_forward(obs, weights, biases, logstd)
    jax.block_until_ready(mean)
    jax.block_until_ready(std)

    ref_mean, ref_std = reference_forward(obs, weights, biases, logstd)
    assert mean.shape == (batch, ac_dim)
    assert std.shape == (ac_dim,)
    # bf16 MXU inputs + bf16 output store -> compare with bf16-level tolerance.
    assert jnp.allclose(mean, ref_mean, atol=2e-2, rtol=2e-2)
    assert jnp.allclose(std, ref_std, atol=1e-6, rtol=1e-6)

    # TODO(synk): action sampling (torch.distributions.Normal), Adam update(), and
    # save() are host-side training logic, not part of the forward kernel.
    print("KERNEL_OK")
</pallas_src>

<mosaic_0001>
module attributes {stable_mosaic.version = 11 : i64} {
  func.func @kernel(%arg0: i32, %arg1: memref<16x16xf32, #tpu.memory_space<vmem>>, %arg2: memref<16x128xbf16, #tpu.memory_space<vmem>>, %arg3: memref<128x128xbf16, #tpu.memory_space<vmem>>, %arg4: memref<128x128xbf16, #tpu.memory_space<vmem>>, %arg5: memref<3x128xf32, #tpu.memory_space<vmem>>, %arg6: memref<16x4xbf16, #tpu.memory_space<vmem>>) attributes {dimension_semantics = [#tpu.dimension_semantics<parallel>], iteration_bounds = array<i64: 1>, scalar_prefetch = 0 : i64, scratch_operands = 0 : i64, tpu.core_type = #tpu.core_type<tc>, window_params = [{transform_indices = @transform_0, window_bounds = array<i64: 16, 16>}, {pipeline_mode = #tpu.pipeline_mode<synchronous>, transform_indices = @transform_1, window_bounds = array<i64: 16, 128>}, {pipeline_mode = #tpu.pipeline_mode<synchronous>, transform_indices = @transform_2, window_bounds = array<i64: 128, 128>}, {pipeline_mode = #tpu.pipeline_mode<synchronous>, transform_indices = @transform_3, window_bounds = array<i64: 128, 128>}, {pipeline_mode = #tpu.pipeline_mode<synchronous>, transform_indices = @transform_4, window_bounds = array<i64: 3, 128>}, {transform_indices = @transform_5, window_bounds = array<i64: 16, 4>}]} {
    %c0 = arith.constant 0 : index
    %c0_0 = arith.constant 0 : index
    %0 = vector.load %arg1[%c0, %c0_0] : memref<16x16xf32, #tpu.memory_space<vmem>>, vector<16x16xf32>
    %1 = arith.truncf %0 : vector<16x16xf32> to vector<16x16xbf16>
    %c0_1 = arith.constant 0 : index
    %c0_2 = arith.constant 0 : index
    %2 = vector.load %arg2[%c0_1, %c0_2] : memref<16x128xbf16, #tpu.memory_space<vmem>>, vector<16x128xbf16>
    %c0_3 = arith.constant 0 : index
    %c0_4 = arith.constant 0 : index
    %3 = vector.load %arg5[%c0_3, %c0_4] : memref<3x128xf32, #tpu.memory_space<vmem>>, vector<1x128xf32>
    %cst = arith.constant dense<0.000000e+00> : vector<16x128xf32>
    %4 = tpu.matmul %1, %2, %cst {dimension_numbers = #tpu.dot_dimension_numbers<[1], [0], [0], [1], [0, 0, 1, 1], [], []>} : vector<16x16xbf16>, vector<16x128xbf16>, vector<16x128xf32> -> vector<16x128xf32>
    %5 = vector.broadcast %3 : vector<1x128xf32> to vector<16x128xf32>
    %6 = arith.addf %4, %5 : vector<16x128xf32>
    %7 = arith.truncf %6 : vector<16x128xf32> to vector<16x128xbf16>
    %8 = math.tanh %7 : vector<16x128xbf16>
    %c0_5 = arith.constant 0 : index
    %c0_6 = arith.constant 0 : index
    %9 = vector.load %arg3[%c0_5, %c0_6] : memref<128x128xbf16, #tpu.memory_space<vmem>>, vector<128x128xbf16>
    %c1 = arith.constant 1 : index
    %c0_7 = arith.constant 0 : index
    %10 = vector.load %arg5[%c1, %c0_7] : memref<3x128xf32, #tpu.memory_space<vmem>>, vector<1x128xf32>
    %cst_8 = arith.constant dense<0.000000e+00> : vector<16x128xf32>
    %11 = tpu.matmul %8, %9, %cst_8 {dimension_numbers = #tpu.dot_dimension_numbers<[1], [0], [0], [1], [0, 0, 1, 1], [], []>} : vector<16x128xbf16>, vector<128x128xbf16>, vector<16x128xf32> -> vector<16x128xf32>
    %12 = vector.broadcast %10 : vector<1x128xf32> to vector<16x128xf32>
    %13 = arith.addf %11, %12 : vector<16x128xf32>
    %14 = arith.truncf %13 : vector<16x128xf32> to vector<16x128xbf16>
    %15 = math.tanh %14 : vector<16x128xbf16>
    %c0_9 = arith.constant 0 : index
    %c0_10 = arith.constant 0 : index
    %16 = vector.load %arg4[%c0_9, %c0_10] : memref<128x128xbf16, #tpu.memory_space<vmem>>, vector<128x128xbf16>
    %c2 = arith.constant 2 : index
    %c0_11 = arith.constant 0 : index
    %17 = vector.load %arg5[%c2, %c0_11] : memref<3x128xf32, #tpu.memory_space<vmem>>, vector<1x128xf32>
    %cst_12 = arith.constant dense<0.000000e+00> : vector<16x128xf32>
    %18 = tpu.matmul %15, %16, %cst_12 {dimension_numbers = #tpu.dot_dimension_numbers<[1], [0], [0], [1], [0, 0, 1, 1], [], []>} : vector<16x128xbf16>, vector<128x128xbf16>, vector<16x128xf32> -> vector<16x128xf32>
    %19 = vector.broadcast %17 : vector<1x128xf32> to vector<16x128xf32>
    %20 = arith.addf %18, %19 : vector<16x128xf32>
    %21 = vector.extract_strided_slice %20 {offsets = [0, 0], sizes = [16, 4], strides = [1, 1]} : vector<16x128xf32> to vector<16x4xf32>
    %22 = arith.truncf %21 : vector<16x4xf32> to vector<16x4xbf16>
    %c0_13 = arith.constant 0 : index
    %c0_14 = arith.constant 0 : index
    %23 = vector.load %arg6[%c0_13, %c0_14] : memref<16x4xbf16, #tpu.memory_space<vmem>>, vector<16x4xbf16>
    tpu.vector_store %arg6[%c0_13, %c0_14], %22 {strides = array<i32>} : memref<16x4xbf16, #tpu.memory_space<vmem>>, vector<16x4xbf16>,
    return
  }
  func.func @transform_0(%arg0: i32) -> (i32, i32) {
    %c0_i32 = arith.constant 0 : i32
    %c0_i32_0 = arith.constant 0 : i32
    return %arg0, %c0_i32 : i32, i32
  }
  func.func @transform_1(%arg0: i32) -> (i32, i32) {
    %c0_i32 = arith.constant 0 : i32
    %c0_i32_0 = arith.constant 0 : i32
    %c0_i32_1 = arith.constant 0 : i32
    return %c0_i32, %c0_i32_0 : i32, i32
  }
  func.func @transform_2(%arg0: i32) -> (i32, i32) {
    %c0_i32 = arith.constant 0 : i32
    %c0_i32_0 = arith.constant 0 : i32
    %c0_i32_1 = arith.constant 0 : i32
    return %c0_i32, %c0_i32_0 : i32, i32
  }
  func.func @transform_3(%arg0: i32) -> (i32, i32) {
    %c0_i32 = arith.constant 0 : i32
    %c0_i32_0 = arith.constant 0 : i32
    %c0_i32_1 = arith.constant 0 : i32
    return %c0_i32, %c0_i32_0 : i32, i32
  }
  func.func @transform_4(%arg0: i32) -> (i32, i32) {
    %c0_i32 = arith.constant 0 : i32
    %c0_i32_0 = arith.constant 0 : i32
    %c0_i32_1 = arith.constant 0 : i32
    return %c0_i32, %c0_i32_0 : i32, i32
  }
  func.func @transform_5(%arg0: i32) -> (i32, i32) {
    %c0_i32 = arith.constant 0 : i32
    %c0_i32_0 = arith.constant 0 : i32
    return %arg0, %c0_i32 : i32, i32
  }
}

module attributes {stable_mosaic.version = 11 : i64} {
  func.func @kernel(%arg0: i32, %arg1: memref<16x16xf32, #tpu.memory_space<vmem>>, %arg2: memref<16x128xbf16, #tpu.memory_space<vmem>>, %arg3: memref<128x128xbf16, #tpu.memory_space<vmem>>, %arg4: memref<128x128xbf16, #tpu.memory_space<vmem>>, %arg5: memref<3x128xf32, #tpu.memory_space<vmem>>, %arg6: memref<16x4xbf16, #tpu.memory_space<vmem>>) attributes {dimension_semantics = [#tpu.dimension_semantics<parallel>], iteration_bounds = array<i64: 1>, scalar_prefetch = 0 : i64, scratch_operands = 0 : i64, tpu.core_type = #tpu.core_type<tc>, window_params = [{transform_indices = @transform_0, window_bounds = array<i64: 16, 16>}, {pipeline_mode = #tpu.pipeline_mode<synchronous>, transform_indices = @transform_1, window_bounds = array<i64: 16, 128>}, {pipeline_mode = #tpu.pipeline_mode<synchronous>, transform_indices = @transform_2, window_bounds = array<i64: 128, 128>}, {pipeline_mode = #tpu.pipeline_mode<synchronous>, transform_indices = @transform_3, window_bounds = array<i64: 128, 128>}, {pipeline_mode = #tpu.pipeline_mode<synchronous>, transform_indices = @transform_4, window_bounds = array<i64: 3, 128>}, {transform_indices = @transform_5, window_bounds = array<i64: 16, 4>}]} {
    %c0 = arith.constant 0 : index
    %c0_0 = arith.constant 0 : index
    %0 = vector.load %arg1[%c0, %c0_0] : memref<16x16xf32, #tpu.memory_space<vmem>>, vector<16x16xf32>
    %1 = arith.truncf %0 : vector<16x16xf32> to vector<16x16xbf16>
    %c0_1 = arith.constant 0 : index
    %c0_2 = arith.constant 0 : index
    %2 = vector.load %arg2[%c0_1, %c0_2] : memref<16x128xbf16, #tpu.memory_space<vmem>>, vector<16x128xbf16>
    %c0_3 = arith.constant 0 : index
    %c0_4 = arith.constant 0 : index
    %3 = vector.load %arg5[%c0_3, %c0_4] : memref<3x128xf32, #tpu.memory_space<vmem>>, vector<1x128xf32>
    %cst = arith.constant dense<0.000000e+00> : vector<16x128xf32>
    %4 = tpu.matmul %1, %2, %cst {dimension_numbers = #tpu.dot_dimension_numbers<[1], [0], [0], [1], [0, 0, 1, 1], [], []>} : vector<16x16xbf16>, vector<16x128xbf16>, vector<16x128xf32> -> vector<16x128xf32>
    %5 = vector.broadcast %3 : vector<1x128xf32> to vector<16x128xf32>
    %6 = arith.addf %4, %5 : vector<16x128xf32>
    %7 = arith.truncf %6 : vector<16x128xf32> to vector<16x128xbf16>
    %8 = math.tanh %7 : vector<16x128xbf16>
    %c0_5 = arith.constant 0 : index
    %c0_6 = arith.constant 0 : index
    %9 = vector.load %arg3[%c0_5, %c0_6] : memref<128x128xbf16, #tpu.memory_space<vmem>>, vector<128x128xbf16>
    %c1 = arith.constant 1 : index
    %c0_7 = arith.constant 0 : index
    %10 = vector.load %arg5[%c1, %c0_7] : memref<3x128xf32, #tpu.memory_space<vmem>>, vector<1x128xf32>
    %cst_8 = arith.constant dense<0.000000e+00> : vector<16x128xf32>
    %11 = tpu.matmul %8, %9, %cst_8 {dimension_numbers = #tpu.dot_dimension_numbers<[1], [0], [0], [1], [0, 0, 1, 1], [], []>} : vector<16x128xbf16>, vector<128x128xbf16>, vector<16x128xf32> -> vector<16x128xf32>
    %12 = vector.broadcast %10 : vector<1x128xf32> to vector<16x128xf32>
    %13 = arith.addf %11, %12 : vector<16x128xf32>
    %14 = arith.truncf %13 : vector<16x128xf32> to vector<16x128xbf16>
    %15 = math.tanh %14 : vector<16x128xbf16>
    %c0_9 = arith.constant 0 : index
    %c0_10 = arith.constant 0 : index
    %16 = vector.load %arg4[%c0_9, %c0_10] : memref<128x128xbf16, #tpu.memory_space<vmem>>, vector<128x128xbf16>
    %c2 = arith.constant 2 : index
    %c0_11 = arith.constant 0 : index
    %17 = vector.load %arg5[%c2, %c0_11] : memref<3x128xf32, #tpu.memory_space<vmem>>, vector<1x128xf32>
    %cst_12 = arith.constant dense<0.000000e+00> : vector<16x128xf32>
    %18 = tpu.matmul %15, %16, %cst_12 {dimension_numbers = #tpu.dot_dimension_numbers<[1], [0], [0], [1], [0, 0, 1, 1], [], []>} : vector<16x128xbf16>, vector<128x128xbf16>, vector<16x128xf32> -> vector<16x128xf32>
    %19 = vector.broadcast %17 : vector<1x128xf32> to vector<16x128xf32>
    %20 = arith.addf %18, %19 : vector<16x128xf32>
    %21 = vector.extract_strided_slice %20 {offsets = [0, 0], sizes = [16, 4], strides = [1, 1]} : vector<16x128xf32> to vector<16x4xf32>
    %22 = arith.truncf %21 : vector<16x4xf32> to vector<16x4xbf16>
    %c0_13 = arith.constant 0 : index
    %c0_14 = arith.constant 0 : index
    %23 = vector.load %arg6[%c0_13, %c0_14] : memref<16x4xbf16, #tpu.memory_space<vmem>>, vector<16x4xbf16>
    tpu.vector_store %arg6[%c0_13, %c0_14], %22 {strides = array<i32>} : memref<16x4xbf16, #tpu.memory_space<vmem>>, vector<16x4xbf16>,
    return
  }
  func.func @transform_0(%arg0: i32) -> (i32, i32) {
    %c0_i32 = arith.constant 0 : i32
    %c0_i32_0 = arith.constant 0 : i32
    return %arg0, %c0_i32 : i32, i32
  }
  func.func @transform_1(%arg0: i32) -> (i32, i32) {
    %c0_i32 = arith.constant 0 : i32
    %c0_i32_0 = arith.constant 0 : i32
    %c0_i32_1 = arith.constant 0 : i32
    return %c0_i32, %c0_i32_0 : i32, i32
  }
  func.func @transform_2(%arg0: i32) -> (i32, i32) {
    %c0_i32 = arith.constant 0 : i32
    %c0_i32_0 = arith.constant 0 : i32
    %c0_i32_1 = arith.constant 0 : i32
    return %c0_i32, %c0_i32_0 : i32, i32
  }
  func.func @transform_3(%arg0: i32) -> (i32, i32) {
    %c0_i32 = arith.constant 0 : i32
    %c0_i32_0 = arith.constant 0 : i32
    %c0_i32_1 = arith.constant 0 : i32
    return %c0_i32, %c0_i32_0 : i32, i32
  }
  func.func @transform_4(%arg0: i32) -> (i32, i32) {
    %c0_i32 = arith.constant 0 : i32
    %c0_i32_0 = arith.constant 0 : i32
    %c0_i32_1 = arith.constant 0 : i32
    return %c0_i32, %c0_i32_0 : i32, i32
  }
  func.func @transform_5(%arg0: i32) -> (i32, i32) {
    %c0_i32 = arith.constant 0 : i32
    %c0_i32_0 = arith.constant 0 : i32
    return %arg0, %c0_i32 : i32, i32
  }
}

</mosaic_0001>

<bundles_post_ra>
// kernel: tpu_custom_call.1
= control target key start
LH: loop header
LB: loop body
LE: loop exit
PB: predicated region body
PF: predicated region fallthrough
CT: control target
= control target key end

     0   :  { %10 = vsyncpa [#allocation3], 0  ;;  %s737_s0 = inlined_call_operand.hbm [shape: f32[16,16], index: 0, kind: input, shape index: {}]   ;;  %s738_s1 = inlined_call_operand.hbm [shape: bf16[16,128], index: 1, kind: input, shape index: {}]   ;;  %s739_s2 = inlined_call_operand.hbm [shape: bf16[128,128], index: 2, kind: input, shape index: {}]   ;;  %s740_s3 = inlined_call_operand.hbm [shape: bf16[128,128], index: 3, kind: input, shape index: {}]   ;;  %s741_s4 = inlined_call_operand.vmem [shape: f32[3,128], index: 4, kind: input, shape index: {}]   ;;  %s742_s5 = inlined_call_operand.vmem [shape: bf16[16,4], index: 5, kind: output, shape index: {}]  }
   0x1   :  { %11 = vsyncpa [#allocation5], 0 }
   0x2   :  { %12 = vsyncpa [#allocation8], 0  ;;  %s595_s18 = smov [#allocation4]   ;;  %s501_s22 = scalar_lea.hbm %s738_s1, 128 }
   0x3   :  { %s30_s19 = sshll.u32 %s595_s18, 4  ;;  %p502_p0 = scmp.ne.s32.totalorder %s738_s1, %s501_s22  ;;  %s31_s19 = int_to_ptr.vmem [resolvable:$true] %s30_s19 }
   0x4   :  { %p505_p1 = scmp.lt.u32.totalorder %s501_s22, %s738_s1 }
   0x6   :  { %p507_p2 = pnand %p505_p1, %p502_p0 }
   0x8   :  { %510 = shalt.err (!%p507_p2)
}
   0x9   :  { %s511_s27 = scalar_lea.vmem %s31_s19, 128  ;;  %p516_p4 = scmp.lt.s32.totalorder %s31_s19, %s31_s19 }
   0xa   :  { %p512_p3 = scmp.ne.s32.totalorder %s31_s19, %s511_s27  ;;  %p517_p5 = scmp.lt.s32.totalorder %s511_s27, %s511_s27 }
   0xc   :  { %p518_p6 = por %p517_p5, %p516_p4 }
   0xe   :  { %p519_p7 = pnand %p518_p6, %p512_p3 }
  0x10   :  { %522 = shalt.err (!%p519_p7)
}
  0x11   :  { %s596_s28 = smov 64   ;;  %s597_s29 = smov 4  }
  0x12   :  { %36 = dma.hbm_to_vmem [thread:$0]  %s738_s1, 128, %s31_s19, [#allocation5], %s596_s28, %s596_s28, %s597_s29  }
  0x13   :  { %s598_s7 = smov [#allocation2]   ;;  %s523_s11 = scalar_lea.hbm %s737_s0, 256 }
  0x14   :  { %s18_s8 = sshll.u32 %s598_s7, 4  ;;  %p524_p8 = scmp.ne.s32.totalorder %s737_s0, %s523_s11  ;;  %s19_s8 = int_to_ptr.vmem [resolvable:$true] %s18_s8 }
  0x15   :  { %p527_p9 = scmp.lt.u32.totalorder %s523_s11, %s737_s0 }
  0x17   :  { %p529_p10 = pnand %p527_p9, %p524_p8 }
  0x19   :  { %532 = shalt.err (!%p529_p10)
}
  0x1a   :  { %s533_s16 = scalar_lea.vmem %s19_s8, 256  ;;  %p538_p12 = scmp.lt.s32.totalorder %s19_s8, %s19_s8 }
  0x1b   :  { %p534_p11 = scmp.ne.s32.totalorder %s19_s8, %s533_s16  ;;  %p539_p13 = scmp.lt.s32.totalorder %s533_s16, %s533_s16 }
  0x1d   :  { %p540_p0 = por %p539_p13, %p538_p12 }
  0x1f   :  { %p541_p1 = pnand %p540_p0, %p534_p11 }
  0x21   :  { %544 = shalt.err (!%p541_p1)
}
  0x22   :  { %s599_s1 = smov 128   ;;  %s600_s17 = smov 8  }
  0x23   :  { %24 = dma.hbm_to_vmem [thread:$0]  %s737_s0, 256, %s19_s8, [#allocation3], %s599_s1, %s599_s1, %s600_s17  }
  0x24   :  { %s601_s20 = smov [#allocation6]   ;;  %s602_s22 = smov [#allocation7]  }
  0x25   :  { %s42_s21 = sshll.u32 %s601_s20, 4  ;;  %s54_s23 = sshll.u32 %s602_s22, 4  ;;  %s43_s21 = int_to_ptr.vmem [resolvable:$true] %s42_s21  ;;  %s662_s23 = int_to_ptr.vmem [resolvable:$true] %s54_s23 }
  0x26   :  { %s545_s26 = scalar_lea.hbm %s739_s2, 1024 }
  0x27   :  { %p546_p2 = scmp.ne.s32.totalorder %s739_s2, %s545_s26  ;;  %p549_p3 = scmp.lt.u32.totalorder %s545_s26, %s739_s2 }
  0x29   :  { %p551_p4 = pnand %p549_p3, %p546_p2 }
  0x2b   :  { %554 = shalt.err (!%p551_p4)
}
  0x2c   :  { %s555_s0 = scalar_lea.vmem %s43_s21, 1024  ;;  %p560_p6 = scmp.lt.s32.totalorder %s43_s21, %s43_s21 }
  0x2d   :  { %p556_p5 = scmp.ne.s32.totalorder %s43_s21, %s555_s0  ;;  %p561_p7 = scmp.lt.s32.totalorder %s555_s0, %s555_s0 }
  0x2f   :  { %p562_p8 = por %p561_p7, %p560_p6 }
  0x31   :  { %p563_p9 = pnand %p562_p8, %p556_p5 }
  0x33   :  { %566 = shalt.err (!%p563_p9)
}
  0x34   :  { %48 = dma.hbm_to_vmem [thread:$0]  %s739_s2, 1024, %s43_s21, [#allocation5], %s596_s28, %s596_s28, %s597_s29  }
  0x35   :  { %s567_s12 = scalar_lea.hbm %s740_s3, 1024 }
  0x36   :  { %p568_p10 = scmp.ne.s32.totalorder %s740_s3, %s567_s12  ;;  %p571_p11 = scmp.lt.u32.totalorder %s567_s12, %s740_s3 }
  0x38   :  { %p573_p12 = pnand %p571_p11, %p568_p10 }
  0x3a   :  { %576 = shalt.err (!%p573_p12)
}
  0x3b   :  { %s577_s1 = scalar_lea.vmem %s662_s23, 1024  ;;  %p582_p0 = scmp.lt.s32.totalorder %s662_s23, %s662_s23 }
  0x3c   :  { %p578_p13 = scmp.ne.s32.totalorder %s662_s23, %s577_s1  ;;  %p583_p1 = scmp.lt.s32.totalorder %s577_s1, %s577_s1 }
  0x3e   :  { %p584_p2 = por %p583_p1, %p582_p0 }
  0x40   :  { %p585_p3 = pnand %p584_p2, %p578_p13 }
  0x42   :  { %588 = shalt.err (!%p585_p3)
}
  0x43   :  { %60 = dma.hbm_to_vmem [thread:$0]  %s740_s3, 1024, %s662_s23, [#allocation8], %s596_s28, %s596_s28, %s597_s29  }
  0x44   :  { %589 = dma.done.wait [#allocation3], 256  }
  0x45   :  { %590 = vsyncadd [#allocation3], 4294967040 }
  0x46   :  { %591 = dma.done.wait [#allocation5], 1152  }
  0x47   :  { %592 = vsyncadd [#allocation5], 4294966144 }
  0x48   :  { %593 = dma.done.wait [#allocation8], 1024  }
  0x49   :  { %594 = vsyncadd [#allocation8], 4294966272  ;;  %v603_v0 = vmov 0.0   ;;  %vm604_vm0 = vmmov 0   ;;  %v480_v1 = vld [vmem:[#allocation4] sm:$0xff]   ;;  %v76_v2 = vld [vmem:[#allocation2] sm:$0xff] }
  0x4a   :  { %424 = vmatprep.subr.bf16.mxu0 %v603_v0  ;;  %426 = vmatprep.mubr.msk.bf16.mxu0 %vm604_vm0, %v603_v0  ;;  %v77_v3 = vld [vmem:[#allocation2 + $0x8] sm:$0xff]  ;;  %vm92_vm1 = vcmask 130048   ;;  %v481_v5 = vld [vmem:[#allocation6] sm:$0xff]   ;;  %v482_v6 = vld [vmem:[#allocation6 + $0x8] sm:$0xff]   ;;  %vm369_vm2 = vcmask 27648  }
  0x4b   :  { %430 = vmatprep.subr.bf16.mxu1 %v603_v0  ;;  %446 = vmatprep.mubr.msk.bf16.mxu1 %vm604_vm0, %v603_v0  ;;  %v78_v4 = vpack.c.bf16 %v77_v3, %v76_v2  ;;  %v483_v7 = vld [vmem:[#allocation6 + $0x10] sm:$0xff]   ;;  %v484_v8 = vld [vmem:[#allocation6 + $0x18] sm:$0xff]   ;;  %v485_v9 = vld [vmem:[#allocation6 + $0x20] sm:$0xff]  }
  0x4c   :  { %425 = vmatpush3.bf16.msra.mxu0 %v480_v1  ;;  %431 = vmatpush3.bf16.msra.mxu1 %v481_v5  ;;  %v486_v10 = vld [vmem:[#allocation6 + $0x28] sm:$0xff]   ;;  %v487_v11 = vld [vmem:[#allocation6 + $0x30] sm:$0xff]   ;;  %v488_v12 = vld [vmem:[#allocation6 + $0x38] sm:$0xff]  }
  0x4d   :  { %450 = vmatprep.subr.bf16.mxu0 %v603_v0  ;;  %432 = vmatprep.subr.bf16.mxu1 %v603_v0  ;;  %v489_v13 = vld [vmem:[#allocation7] sm:$0xff]   ;;  %v490_v14 = vld [vmem:[#allocation7 + $0x8] sm:$0xff]   ;;  %v491_v15 = vld [vmem:[#allocation7 + $0x10] sm:$0xff]  }
  0x4e   :  { %v379_v16 = vld [vmem:[%s741_s4] ss:$0 sm:$0xff]  ;;  %v492_v25 = vld [vmem:[#allocation7 + $0x18] sm:$0xff]   ;;  %v493_v26 = vld [vmem:[#allocation7 + $0x20] sm:$0xff]  }
  0x4f   :  { %427 = vmatmul.mubr.msk.bf16.vlgmr.msra.gmra.mrb[0].mxu0 %vm92_vm1, %v78_v4  ;;  %v494_v27 = vld [vmem:[#allocation7 + $0x28] sm:$0xff]   ;;  %v495_v28 = vld [vmem:[#allocation7 + $0x30] sm:$0xff]   ;;  %v496_v29 = vld [vmem:[#allocation7 + $0x38] sm:$0xff]  }
  0x50   :  { %466 = vmatprep.mubr.msk.bf16.mxu0 %vm604_vm0, %v603_v0  ;;  %433 = vmatpush3.bf16.msra.mxu1 %v482_v6  ;;  %v382_v30 = vld [vmem:[%s741_s4 + $0x1] ss:$0 sm:$0xff]  ;;  %v391_v39 = vld [vmem:[%s741_s4 + $0x2] ss:$0 sm:$0xff] }
  0x51   :  { %434 = vmatprep.subr.bf16.mxu1 %v603_v0  ;;  %451 = vmatpush3.bf16.msra.mxu0 %v489_v13 }
  0x52   :  { %452 = vmatprep.subr.bf16.mxu0 %v603_v0 }
  0x54   :  { %435 = vmatpush3.bf16.msra.mxu1 %v483_v7 }
  0x55   :  { %436 = vmatprep.subr.bf16.mxu1 %v603_v0  ;;  %453 = vmatpush3.bf16.msra.mxu0 %v490_v14 }
  0x56   :  { %454 = vmatprep.subr.bf16.mxu0 %v603_v0 }
  0x58   :  { %437 = vmatpush3.bf16.msra.mxu1 %v484_v8 }
  0x59   :  { %438 = vmatprep.subr.bf16.mxu1 %v603_v0  ;;  %455 = vmatpush3.bf16.msra.mxu0 %v491_v15 }
  0x5a   :  { %456 = vmatprep.subr.bf16.mxu0 %v603_v0 }
  0x5c   :  { %439 = vmatpush3.bf16.msra.mxu1 %v485_v9 }
  0x5d   :  { %440 = vmatprep.subr.bf16.mxu1 %v603_v0  ;;  %457 = vmatpush3.bf16.msra.mxu0 %v492_v25 }
  0x5e   :  { %458 = vmatprep.subr.bf16.mxu0 %v603_v0 }
  0x60   :  { %441 = vmatpush3.bf16.msra.mxu1 %v486_v10 }
  0x61   :  { %442 = vmatprep.subr.bf16.mxu1 %v603_v0  ;;  %459 = vmatpush3.bf16.msra.mxu0 %v493_v26 }
  0x62   :  { %460 = vmatprep.subr.bf16.mxu0 %v603_v0 }
  0x64   :  { %443 = vmatpush3.bf16.msra.mxu1 %v487_v11 }
  0x65   :  { %444 = vmatprep.subr.bf16.mxu1 %v603_v0  ;;  %461 = vmatpush3.bf16.msra.mxu0 %v494_v27 }
  0x66   :  { %462 = vmatprep.subr.bf16.mxu0 %v603_v0 }
  0x68   :  { %445 = vmatpush3.bf16.msra.mxu1 %v488_v12 }
  0x69   :  { %463 = vmatpush3.bf16.msra.mxu0 %v495_v28 }
  0x6a   :  { %464 = vmatprep.subr.bf16.mxu0 %v603_v0 }
  0x6d   :  { %465 = vmatpush3.bf16.msra.mxu0 %v496_v29 }
 0x122   :  { %v130_v17 = vpop.f32.mrb[0].mxu0 }
 0x123   :  { %v428_v18 = vpop.f32.mrb[1].mxu0  ;;  %v131_v20 = vadd.f32 %v379_v16, %v130_v17 }
 0x124   :  { %v133_v19 = vpop.f32.mrb[2].mxu0 }
 0x125   :  { %v134_v21 = vadd.f32 %v379_v16, %v133_v19  ;;  %v429_v22 = vpop.f32.mrb[3].mxu0 }
 0x127   :  { %v137_v23 = vpack.c.bf16 %v134_v21, %v131_v20 }
 0x129   :  { %497 = vtanh.bf16 %v137_v23 }
 0x134   :  { %v498_v24 = vpop.eup %497 }
 0x135   :  { %447 = vmatmul.mubr.bf16.vlgmr.msra.gmra.mrb[0].mxu1 %v498_v24 }
 0x208   :  { %v242_v31 = vpop.f32.mrb[0].mxu1 }
 0x209   :  { %v448_v32 = vpop.f32.mrb[1].mxu1  ;;  %v243_v34 = vadd.f32 %v382_v30, %v242_v31 }
 0x20a   :  { %v245_v33 = vpop.f32.mrb[2].mxu1 }
 0x20b   :  { %v246_v35 = vadd.f32 %v382_v30, %v245_v33  ;;  %v449_v36 = vpop.f32.mrb[3].mxu1 }
 0x20d   :  { %v249_v37 = vpack.c.bf16 %v246_v35, %v243_v34 }
 0x20f   :  { %499 = vtanh.bf16 %v249_v37 }
 0x21a   :  { %v500_v38 = vpop.eup %499 }
 0x21b   :  { %467 = vmatmul.mubr.bf16.vlgmr.msra.gmra.mrb[4].mxu0 %v500_v38 }
 0x2ee   :  { %v354_v40 = vpop.f32.mrb[4].mxu0 }
 0x2ef   :  { %v355_v41 = vadd.f32 %v391_v39, %v354_v40  ;;  %v468_v42 = vpop.f32.mrb[5].mxu0 }
 0x2f0   :  { %v357_v43 = vpop.f32.mrb[6].mxu0 }
 0x2f1   :  { %v402_v44 = vpack.c.bf16 %v355_v41, %v355_v41  ;;  %v358_v45 = vadd.f32 %v391_v39, %v357_v43  ;;  %v469_v46 = vpop.f32.mrb[7].mxu0 }
 0x2f3   :  { %370 = vst.msk [vmem:[%s742_s5] sm:$0xf] %vm369_vm2, %v402_v44  ;;  %v403_v47 = vpack.c.bf16 %v358_v45, %v358_v45 }
 0x2f5   :  { %371 = vst.msk [vmem:[%s742_s5 + $0x4] sm:$0xf] %vm369_vm2, %v403_v47 }
 0x2f6   :  { %376 = vsyncpa [#allocation3], 1 }
 0x2f7   :  { %377 = vsyncpa [#allocation5], 1 }
 0x2f8   :  { %378 = vsyncpa [#allocation8], 1 }

// kernel: tpu_custom_call.1
= control target key start
LH: loop header
LB: loop body
LE: loop exit
PB: predicated region body
PF: predicated region fallthrough
CT: control target
= control target key end

     0   :  { %10 = vsyncpa [#allocation3], 0  ;;  %s737_s0 = inlined_call_operand.hbm [shape: f32[16,16], index: 0, kind: input, shape index: {}]   ;;  %s738_s1 = inlined_call_operand.hbm [shape: bf16[16,128], index: 1, kind: input, shape index: {}]   ;;  %s739_s2 = inlined_call_operand.hbm [shape: bf16[128,128], index: 2, kind: input, shape index: {}]   ;;  %s740_s3 = inlined_call_operand.hbm [shape: bf16[128,128], index: 3, kind: input, shape index: {}]   ;;  %s741_s4 = inlined_call_operand.vmem [shape: f32[3,128], index: 4, kind: input, shape index: {}]   ;;  %s742_s5 = inlined_call_operand.vmem [shape: bf16[16,4], index: 5, kind: output, shape index: {}]  }
   0x1   :  { %11 = vsyncpa [#allocation5], 0 }
   0x2   :  { %12 = vsyncpa [#allocation8], 0  ;;  %s595_s18 = smov [#allocation4]   ;;  %s501_s22 = scalar_lea.hbm %s738_s1, 128 }
   0x3   :  { %s30_s19 = sshll.u32 %s595_s18, 4  ;;  %p502_p0 = scmp.ne.s32.totalorder %s738_s1, %s501_s22  ;;  %s31_s19 = int_to_ptr.vmem [resolvable:$true] %s30_s19 }
   0x4   :  { %p505_p1 = scmp.lt.u32.totalorder %s501_s22, %s738_s1 }
   0x6   :  { %p507_p2 = pnand %p505_p1, %p502_p0 }
   0x8   :  { %510 = shalt.err (!%p507_p2)
}
   0x9   :  { %s511_s27 = scalar_lea.vmem %s31_s19, 128  ;;  %p516_p4 = scmp.lt.s32.totalorder %s31_s19, %s31_s19 }
   0xa   :  { %p512_p3 = scmp.ne.s32.totalorder %s31_s19, %s511_s27  ;;  %p517_p5 = scmp.lt.s32.totalorder %s511_s27, %s511_s27 }
   0xc   :  { %p518_p6 = por %p517_p5, %p516_p4 }
   0xe   :  { %p519_p7 = pnand %p518_p6, %p512_p3 }
  0x10   :  { %522 = shalt.err (!%p519_p7)
}
  0x11   :  { %s596_s28 = smov 64   ;;  %s597_s29 = smov 4  }
  0x12   :  { %36 = dma.hbm_to_vmem [thread:$0]  %s738_s1, 128, %s31_s19, [#allocation5], %s596_s28, %s596_s28, %s597_s29  }
  0x13   :  { %s598_s7 = smov [#allocation2]   ;;  %s523_s11 = scalar_lea.hbm %s737_s0, 256 }
  0x14   :  { %s18_s8 = sshll.u32 %s598_s7, 4  ;;  %p524_p8 = scmp.ne.s32.totalorder %s737_s0, %s523_s11  ;;  %s19_s8 = int_to_ptr.vmem [resolvable:$true] %s18_s8 }
  0x15   :  { %p527_p9 = scmp.lt.u32.totalorder %s523_s11, %s737_s0 }
  0x17   :  { %p529_p10 = pnand %p527_p9, %p524_p8 }
  0x19   :  { %532 = shalt.err (!%p529_p10)
}
  0x1a   :  { %s533_s16 = scalar_lea.vmem %s19_s8, 256  ;;  %p538_p12 = scmp.lt.s32.totalorder %s19_s8, %s19_s8 }
  0x1b   :  { %p534_p11 = scmp.ne.s32.totalorder %s19_s8, %s533_s16  ;;  %p539_p13 = scmp.lt.s32.totalorder %s533_s16, %s533_s16 }
  0x1d   :  { %p540_p0 = por %p539_p13, %p538_p12 }
  0x1f   :  { %p541_p1 = pnand %p540_p0, %p534_p11 }
  0x21   :  { %544 = shalt.err (!%p541_p1)
}
  0x22   :  { %s599_s1 = smov 128   ;;  %s600_s17 = smov 8  }
  0x23   :  { %24 = dma.hbm_to_vmem [thread:$0]  %s737_s0, 256, %s19_s8, [#allocation3], %s599_s1, %s599_s1, %s600_s17  }
  0x24   :  { %s601_s20 = smov [#allocation6]   ;;  %s602_s22 = smov [#allocation7]  }
  0x25   :  { %s42_s21 = sshll.u32 %s601_s20, 4  ;;  %s54_s23 = sshll.u32 %s602_s22, 4  ;;  %s43_s21 = int_to_ptr.vmem [resolvable:$true] %s42_s21  ;;  %s662_s23 = int_to_ptr.vmem [resolvable:$true] %s54_s23 }
  0x26   :  { %s545_s26 = scalar_lea.hbm %s739_s2, 1024 }
  0x27   :  { %p546_p2 = scmp.ne.s32.totalorder %s739_s2, %s545_s26  ;;  %p549_p3 = scmp.lt.u32.totalorder %s545_s26, %s739_s2 }
  0x29   :  { %p551_p4 = pnand %p549_p3, %p546_p2 }
  0x2b   :  { %554 = shalt.err (!%p551_p4)
}
  0x2c   :  { %s555_s0 = scalar_lea.vmem %s43_s21, 1024  ;;  %p560_p6 = scmp.lt.s32.totalorder %s43_s21, %s43_s21 }
  0x2d   :  { %p556_p5 = scmp.ne.s32.totalorder %s43_s21, %s555_s0  ;;  %p561_p7 = scmp.lt.s32.totalorder %s555_s0, %s555_s0 }
  0x2f   :  { %p562_p8 = por %p561_p7, %p560_p6 }
  0x31   :  { %p563_p9 = pnand %p562_p8, %p556_p5 }
  0x33   :  { %566 = shalt.err (!%p563_p9)
}
  0x34   :  { %48 = dma.hbm_to_vmem [thread:$0]  %s739_s2, 1024, %s43_s21, [#allocation5], %s596_s28, %s596_s28, %s597_s29  }
  0x35   :  { %s567_s12 = scalar_lea.hbm %s740_s3, 1024 }
  0x36   :  { %p568_p10 = scmp.ne.s32.totalorder %s740_s3, %s567_s12  ;;  %p571_p11 = scmp.lt.u32.totalorder %s567_s12, %s740_s3 }
  0x38   :  { %p573_p12 = pnand %p571_p11, %p568_p10 }
  0x3a   :  { %576 = shalt.err (!%p573_p12)
}
  0x3b   :  { %s577_s1 = scalar_lea.vmem %s662_s23, 1024  ;;  %p582_p0 = scmp.lt.s32.totalorder %s662_s23, %s662_s23 }
  0x3c   :  { %p578_p13 = scmp.ne.s32.totalorder %s662_s23, %s577_s1  ;;  %p583_p1 = scmp.lt.s32.totalorder %s577_s1, %s577_s1 }
  0x3e   :  { %p584_p2 = por %p583_p1, %p582_p0 }
  0x40   :  { %p585_p3 = pnand %p584_p2, %p578_p13 }
  0x42   :  { %588 = shalt.err (!%p585_p3)
}
  0x43   :  { %60 = dma.hbm_to_vmem [thread:$0]  %s740_s3, 1024, %s662_s23, [#allocation8], %s596_s28, %s596_s28, %s597_s29  }
  0x44   :  { %589 = dma.done.wait [#allocation3], 256  }
  0x45   :  { %590 = vsyncadd [#allocation3], 4294967040 }
  0x46   :  { %591 = dma.done.wait [#allocation5], 1152  }
  0x47   :  { %592 = vsyncadd [#allocation5], 4294966144 }
  0x48   :  { %593 = dma.done.wait [#allocation8], 1024  }
  0x49   :  { %594 = vsyncadd [#allocation8], 4294966272  ;;  %v603_v0 = vmov 0.0   ;;  %vm604_vm0 = vmmov 0   ;;  %v480_v1 = vld [vmem:[#allocation4] sm:$0xff]   ;;  %v76_v2 = vld [vmem:[#allocation2] sm:$0xff] }
  0x4a   :  { %424 = vmatprep.subr.bf16.mxu0 %v603_v0  ;;  %426 = vmatprep.mubr.msk.bf16.mxu0 %vm604_vm0, %v603_v0  ;;  %v77_v3 = vld [vmem:[#allocation2 + $0x8] sm:$0xff]  ;;  %vm92_vm1 = vcmask 130048   ;;  %v481_v5 = vld [vmem:[#allocation6] sm:$0xff]   ;;  %v482_v6 = vld [vmem:[#allocation6 + $0x8] sm:$0xff]   ;;  %vm369_vm2 = vcmask 27648  }
  0x4b   :  { %430 = vmatprep.subr.bf16.mxu1 %v603_v0  ;;  %446 = vmatprep.mubr.msk.bf16.mxu1 %vm604_vm0, %v603_v0  ;;  %v78_v4 = vpack.c.bf16 %v77_v3, %v76_v2  ;;  %v483_v7 = vld [vmem:[#allocation6 + $0x10] sm:$0xff]   ;;  %v484_v8 = vld [vmem:[#allocation6 + $0x18] sm:$0xff]   ;;  %v485_v9 = vld [vmem:[#allocation6 + $0x20] sm:$0xff]  }
  0x4c   :  { %425 = vmatpush3.bf16.msra.mxu0 %v480_v1  ;;  %431 = vmatpush3.bf16.msra.mxu1 %v481_v5  ;;  %v486_v10 = vld [vmem:[#allocation6 + $0x28] sm:$0xff]   ;;  %v487_v11 = vld [vmem:[#allocation6 + $0x30] sm:$0xff]   ;;  %v488_v12 = vld [vmem:[#allocation6 + $0x38] sm:$0xff]  }
  0x4d   :  { %450 = vmatprep.subr.bf16.mxu0 %v603_v0  ;;  %432 = vmatprep.subr.bf16.mxu1 %v603_v0  ;;  %v489_v13 = vld [vmem:[#allocation7] sm:$0xff]   ;;  %v490_v14 = vld [vmem:[#allocation7 + $0x8] sm:$0xff]   ;;  %v491_v15 = vld [vmem:[#allocation7 + $0x10] sm:$0xff]  }
  0x4e   :  { %v379_v16 = vld [vmem:[%s741_s4] ss:$0 sm:$0xff]  ;;  %v492_v25 = vld [vmem:[#allocation7 + $0x18] sm:$0xff]   ;;  %v493_v26 = vld [vmem:[#allocation7 + $0x20] sm:$0xff]  }
  0x4f   :  { %427 = vmatmul.mubr.msk.bf16.vlgmr.msra.gmra.mrb[0].mxu0 %vm92_vm1, %v78_v4  ;;  %v494_v27 = vld [vmem:[#allocation7 + $0x28] sm:$0xff]   ;;  %v495_v28 = vld [vmem:[#allocation7 + $0x30] sm:$0xff]   ;;  %v496_v29 = vld [vmem:[#allocation7 + $0x38] sm:$0xff]  }
  0x50   :  { %466 = vmatprep.mubr.msk.bf16.mxu0 %vm604_vm0, %v603_v0  ;;  %433 = vmatpush3.bf16.msra.mxu1 %v482_v6  ;;  %v382_v30 = vld [vmem:[%s741_s4 + $0x1] ss:$0 sm:$0xff]  ;;  %v391_v39 = vld [vmem:[%s741_s4 + $0x2] ss:$0 sm:$0xff] }
  0x51   :  { %434 = vmatprep.subr.bf16.mxu1 %v603_v0  ;;  %451 = vmatpush3.bf16.msra.mxu0 %v489_v13 }
  0x52   :  { %452 = vmatprep.subr.bf16.mxu0 %v603_v0 }
  0x54   :  { %435 = vmatpush3.bf16.msra.mxu1 %v483_v7 }
  0x55   :  { %436 = vmatprep.subr.bf16.mxu1 %v603_v0  ;;  %453 = vmatpush3.bf16.msra.mxu0 %v490_v14 }
  0x56   :  { %454 = vmatprep.subr.bf16.mxu0 %v603_v0 }
  0x58   :  { %437 = vmatpush3.bf16.msra.mxu1 %v484_v8 }
  0x59   :  { %438 = vmatprep.subr.bf16.mxu1 %v603_v0  ;;  %455 = vmatpush3.bf16.msra.mxu0 %v491_v15 }
  0x5a   :  { %456 = vmatprep.subr.bf16.mxu0 %v603_v0 }
  0x5c   :  { %439 = vmatpush3.bf16.msra.mxu1 %v485_v9 }
  0x5d   :  { %440 = vmatprep.subr.bf16.mxu1 %v603_v0  ;;  %457 = vmatpush3.bf16.msra.mxu0 %v492_v25 }
  0x5e   :  { %458 = vmatprep.subr.bf16.mxu0 %v603_v0 }
  0x60   :  { %441 = vmatpush3.bf16.msra.mxu1 %v486_v10 }
  0x61   :  { %442 = vmatprep.subr.bf16.mxu1 %v603_v0  ;;  %459 = vmatpush3.bf16.msra.mxu0 %v493_v26 }
  0x62   :  { %460 = vmatprep.subr.bf16.mxu0 %v603_v0 }
  0x64   :  { %443 = vmatpush3.bf16.msra.mxu1 %v487_v11 }
  0x65   :  { %444 = vmatprep.subr.bf16.mxu1 %v603_v0  ;;  %461 = vmatpush3.bf16.msra.mxu0 %v494_v27 }
  0x66   :  { %462 = vmatprep.subr.bf16.mxu0 %v603_v0 }
  0x68   :  { %445 = vmatpush3.bf16.msra.mxu1 %v488_v12 }
  0x69   :  { %463 = vmatpush3.bf16.msra.mxu0 %v495_v28 }
  0x6a   :  { %464 = vmatprep.subr.bf16.mxu0 %v603_v0 }
  0x6d   :  { %465 = vmatpush3.bf16.msra.mxu0 %v496_v29 }
 0x122   :  { %v130_v17 = vpop.f32.mrb[0].mxu0 }
 0x123   :  { %v428_v18 = vpop.f32.mrb[1].mxu0  ;;  %v131_v20 = vadd.f32 %v379_v16, %v130_v17 }
 0x124   :  { %v133_v19 = vpop.f32.mrb[2].mxu0 }
 0x125   :  { %v134_v21 = vadd.f32 %v379_v16, %v133_v19  ;;  %v429_v22 = vpop.f32.mrb[3].mxu0 }
 0x127   :  { %v137_v23 = vpack.c.bf16 %v134_v21, %v131_v20 }
 0x129   :  { %497 = vtanh.bf16 %v137_v23 }
 0x134   :  { %v498_v24 = vpop.eup %497 }
 0x135   :  { %447 = vmatmul.mubr.bf16.vlgmr.msra.gmra.mrb[0].mxu1 %v498_v24 }
 0x208   :  { %v242_v31 = vpop.f32.mrb[0].mxu1 }
 0x209   :  { %v448_v32 = vpop.f32.mrb[1].mxu1  ;;  %v243_v34 = vadd.f32 %v382_v30, %v242_v31 }
 0x20a   :  { %v245_v33 = vpop.f32.mrb[2].mxu1 }
 0x20b   :  { %v246_v35 = vadd.f32 %v382_v30, %v245_v33  ;;  %v449_v36 = vpop.f32.mrb[3].mxu1 }
 0x20d   :  { %v249_v37 = vpack.c.bf16 %v246_v35, %v243_v34 }
 0x20f   :  { %499 = vtanh.bf16 %v249_v37 }
 0x21a   :  { %v500_v38 = vpop.eup %499 }
 0x21b   :  { %467 = vmatmul.mubr.bf16.vlgmr.msra.gmra.mrb[4].mxu0 %v500_v38 }
 0x2ee   :  { %v354_v40 = vpop.f32.mrb[4].mxu0 }
 0x2ef   :  { %v355_v41 = vadd.f32 %v391_v39, %v354_v40  ;;  %v468_v42 = vpop.f32.mrb[5].mxu0 }
 0x2f0   :  { %v357_v43 = vpop.f32.mrb[6].mxu0 }
 0x2f1   :  { %v402_v44 = vpack.c.bf16 %v355_v41, %v355_v41  ;;  %v358_v45 = vadd.f32 %v391_v39, %v357_v43  ;;  %v469_v46 = vpop.f32.mrb[7].mxu0 }
 0x2f3   :  { %370 = vst.msk [vmem:[%s742_s5] sm:$0xf] %vm369_vm2, %v402_v44  ;;  %v403_v47 = vpack.c.bf16 %v358_v45, %v358_v45 }
 0x2f5   :  { %371 = vst.msk [vmem:[%s742_s5 + $0x4] sm:$0xf] %vm369_vm2, %v403_v47 }
 0x2f6   :  { %376 = vsyncpa [#allocation3], 1 }
 0x2f7   :  { %377 = vsyncpa [#allocation5], 1 }
 0x2f8   :  { %378 = vsyncpa [#allocation8], 1 }

</bundles_post_ra>
